<compile_context>
chip_gen: v7x
topology: tpu7x:2x2x1
jax: 0.10.0
libtpu: 0.0.40
codegen_flags: <defaults>
</compile_context>

<pallas_src>
import functools

import jax
import jax.numpy as jnp
from jax.experimental import pallas as pl
from jax.experimental.pallas import tpu as pltpu


def _round_up(x: int, m: int) -> int:
    return ((x + m - 1) // m) * m


def _matmul_bias_kernel(a_ref, b_ref, bias_ref, o_ref, acc_ref, *, relu):
    """One (tm, tn) output tile: acc += a_tile @ b_tile over K; bias/relu epilogue."""
    k = pl.program_id(2)

    @pl.when(k == 0)
    def _():
        acc_ref[...] = jnp.zeros_like(acc_ref)

    a = a_ref[...]
    b = b_ref[...]
    if a.dtype != jnp.float32:
        a = a.astype(jnp.float32)   # bf16 adjacency holds exact small ints -> exact f32
    if b.dtype != jnp.float32:
        b = b.astype(jnp.float32)
    acc_ref[...] += jnp.dot(a, b, preferred_element_type=jnp.float32)

    @pl.when(k == pl.num_programs(2) - 1)
    def _():
        out = acc_ref[...] + bias_ref[...]          # (tm, tn) + (1, tn) broadcast
        if relu:
            out = jnp.maximum(out, 0.0)
        o_ref[...] = out.astype(o_ref.dtype)


def matmul_bias(a, b, bias=None, *, relu=False, tm_max=256, tk_max=512, tn_max=256):
    """out = [relu](a @ b + bias); a: (M, K) f32/bf16, b: (K, N) f32, bias: (N,) or None.

    Tiled (M, N, K) Pallas matmul with f32 accumulation. Inputs are zero-padded to
    the tile grid and the result is sliced back to (M, N).
    """
    M, K = a.shape
    K2, N = b.shape
    assert K == K2, (a.shape, b.shape)
    if bias is None:
        bias = jnp.zeros((N,), jnp.float32)

    # Tiles: multiples of 128 (lane-dense / MXU-friendly), capped so the
    # double-buffered working set stays small enough for every TPU generation.
    tm = min(tm_max, _round_up(M, 128))
    tk = min(tk_max, _round_up(K, 128))
    tn = min(tn_max, _round_up(N, 128))
    Mp, Kp, Np = _round_up(M, tm), _round_up(K, tk), _round_up(N, tn)

    a_p = a if (Mp, Kp) == (M, K) else jnp.zeros((Mp, Kp), a.dtype).at[:M, :K].set(a)
    b_p = b if (Kp, Np) == (K, N) else jnp.zeros((Kp, Np), b.dtype).at[:K, :N].set(b)
    bias_p = jnp.zeros((1, Np), jnp.float32).at[0, :N].set(bias.astype(jnp.float32))

    grid = (Mp // tm, Np // tn, Kp // tk)

    out = pl.pallas_call(
        functools.partial(_matmul_bias_kernel, relu=relu),
        out_shape=jax.ShapeDtypeStruct((Mp, Np), jnp.float32),
        grid_spec=pltpu.PrefetchScalarGridSpec(
            num_scalar_prefetch=0,
            grid=grid,
            in_specs=[
                pl.BlockSpec((tm, tk), lambda i, j, k: (i, k)),
                pl.BlockSpec((tk, tn), lambda i, j, k: (k, j)),
                pl.BlockSpec((1, tn), lambda i, j, k: (0, j)),
            ],
            out_specs=pl.BlockSpec((tm, tn), lambda i, j, k: (i, j)),
            scratch_shapes=[pltpu.VMEM((tm, tn), jnp.float32)],
        ),
        compiler_params=pltpu.CompilerParams(
            dimension_semantics=("parallel", "parallel", "arbitrary")),
        cost_estimate=pl.CostEstimate(
            flops=2 * Mp * Kp * Np,
            transcendentals=0,
            bytes_accessed=(a_p.size * a_p.dtype.itemsize
                            + b_p.size * b_p.dtype.itemsize
                            + Mp * Np * 4),
        ),
    )(a_p, b_p, bias_p)
    return out[:M, :N]


def message_layer(adj, n_feat):
    """MessageLayer.forward: out = n_feat + A @ n_feat == (A + I) @ n_feat (exact in f32)."""
    n = adj.shape[0]
    a_plus_i = adj + jnp.eye(n, dtype=adj.dtype)
    # Edge multiplicities (+1 diagonal) are small integers: bf16 cast is lossless
    # and halves the HBM traffic of the dominant (N, N) operand.
    return matmul_bias(a_plus_i.astype(jnp.bfloat16), n_feat.astype(jnp.float32))


def graph_conv(adj, x, weight, bias, *, relu=False):
    """DGL GraphConv(norm='both', weight=True, bias=True) on a dense adjacency."""
    out_deg = jnp.maximum(adj.sum(axis=0), 1.0)     # out-degree of each src node
    in_deg = jnp.maximum(adj.sum(axis=1), 1.0)      # in-degree of each dst node
    x_src = x * (out_deg[:, None] ** -0.5)
    agg = matmul_bias(adj.astype(jnp.bfloat16), x_src)        # A @ (D_out^-1/2 x)  (MXU)
    agg = agg * (in_deg[:, None] ** -0.5)
    return matmul_bias(agg, weight, bias=bias, relu=relu)     # (.) @ W + b, fused relu


def gcn_forward(adj, in_feat, params):
    """GCN.forward: 3x MessageLayer -> GraphConv -> ReLU -> GraphConv (dropout=0)."""
    h = in_feat
    for _ in range(3):
        h = message_layer(adj, h)
    h = graph_conv(adj, h, params["w1"], params["b1"], relu=True)
    h = graph_conv(adj, h, params["w3"], params["b3"], relu=False)
    return h


def _gcn_reference(adj, in_feat, params):
    """Pure-JAX reference with identical math."""
    h = in_feat
    for _ in range(3):
        h = h + adj @ h
    out_deg = jnp.maximum(adj.sum(axis=0), 1.0)
    in_deg = jnp.maximum(adj.sum(axis=1), 1.0)

    def conv(h, w, b):
        hs = h * (out_deg[:, None] ** -0.5)
        agg = (adj @ hs) * (in_deg[:, None] ** -0.5)
        return agg @ w + b

    h = jax.nn.relu(conv(h, params["w1"], params["b1"]))
    return conv(h, params["w3"], params["b3"])


if __name__ == "__main__":
    key = jax.random.PRNGKey(0)
    k_feat, k_edge, k_w1, k_b1, k_w3, k_b3 = jax.random.split(key, 6)

    # Small graph: N nodes, in_feats=32 -> h_feats1=64 -> num_outputs=8.
    N, IN_F, H1, OUT_F = 16, 32, 64, 8

    n_feat = jax.random.normal(k_feat, (N, IN_F), dtype=jnp.float32)

    # Deterministic random directed graph (~25% density, no self loops),
    # as a dense adjacency: adj[dst, src] = 1.0 iff edge src -> dst.
    edge_probs = jax.random.uniform(k_edge, (N, N))
    adj = (edge_probs < 0.25).astype(jnp.float32)
    adj = adj * (1.0 - jnp.eye(N, dtype=jnp.float32))

    params = {
        "w1": jax.random.normal(k_w1, (IN_F, H1), jnp.float32) / jnp.sqrt(jnp.float32(IN_F)),
        "b1": 0.1 * jax.random.normal(k_b1, (H1,), jnp.float32),
        "w3": jax.random.normal(k_w3, (H1, OUT_F), jnp.float32) / jnp.sqrt(jnp.float32(H1)),
        "b3": 0.1 * jax.random.normal(k_b3, (OUT_F,), jnp.float32),
    }

    # Check the core graph-aggregation kernel (one MessageLayer).
    msg_out = message_layer(adj, n_feat)
    jax.block_until_ready(msg_out)
    msg_ref = n_feat + adj @ n_feat
    assert jnp.allclose(msg_out, msg_ref, atol=1e-5, rtol=1e-5), "MessageLayer mismatch"

    # Full GCN forward pass.
    out = gcn_forward(adj, n_feat, params)
    jax.block_until_ready(out)
    ref = _gcn_reference(adj, n_feat, params)
    assert out.shape == (N, OUT_F)
    assert jnp.allclose(out, ref, atol=1e-4, rtol=1e-4), "GCN forward mismatch"

    print("KERNEL_OK")
</pallas_src>

<mosaic_0001>
module attributes {stable_mosaic.version = 11 : i64} {
  func.func @_matmul_bias_kernel(%arg0: i32, %arg1: i32, %arg2: i32, %arg3: memref<128x128xbf16, #tpu.memory_space<vmem>>, %arg4: memref<128x128xf32, #tpu.memory_space<vmem>>, %arg5: memref<1x128xf32, #tpu.memory_space<vmem>>, %arg6: memref<128x128xf32, #tpu.memory_space<vmem>>, %arg7: memref<128x128xf32, #tpu.memory_space<vmem>>) attributes {dimension_semantics = [#tpu.dimension_semantics<parallel>, #tpu.dimension_semantics<parallel>, #tpu.dimension_semantics<arbitrary>], iteration_bounds = array<i64: 1, 1, 1>, scalar_prefetch = 0 : i64, scratch_operands = 1 : i64, tpu.core_type = #tpu.core_type<tc>, window_params = [{transform_indices = @transform_0, window_bounds = array<i64: 128, 128>}, {transform_indices = @transform_1, window_bounds = array<i64: 128, 128>}, {transform_indices = @transform_2, window_bounds = array<i64: 1, 128>}, {transform_indices = @transform_3, window_bounds = array<i64: 128, 128>}]} {
    %c0_i32 = arith.constant 0 : i32
    %0 = arith.cmpi eq, %arg2, %c0_i32 : i32
    %1 = arith.extui %0 : i1 to i32
    %c0_i32_0 = arith.constant 0 : i32
    %2 = arith.cmpi ne, %1, %c0_i32_0 : i32
    scf.if %2 {
      %cst_10 = arith.constant 0.000000e+00 : f32
      %13 = vector.broadcast %cst_10 : f32 to vector<128x128xf32>
      %c0_11 = arith.constant 0 : index
      %c0_12 = arith.constant 0 : index
      %14 = vector.load %arg7[%c0_11, %c0_12] : memref<128x128xf32, #tpu.memory_space<vmem>>, vector<128x128xf32>
      tpu.vector_store %arg7[%c0_11, %c0_12], %13 {strides = array<i32>} : memref<128x128xf32, #tpu.memory_space<vmem>>, vector<128x128xf32>,
    } else {
    }
    %c0 = arith.constant 0 : index
    %c0_1 = arith.constant 0 : index
    %3 = vector.load %arg3[%c0, %c0_1] : memref<128x128xbf16, #tpu.memory_space<vmem>>, vector<128x128xbf16>
    %c0_2 = arith.constant 0 : index
    %c0_3 = arith.constant 0 : index
    %4 = vector.load %arg4[%c0_2, %c0_3] : memref<128x128xf32, #tpu.memory_space<vmem>>, vector<128x128xf32>
    %5 = arith.extf %3 : vector<128x128xbf16> to vector<128x128xf32>
    %c0_4 = arith.constant 0 : index
    %c0_5 = arith.constant 0 : index
    %6 = vector.load %arg7[%c0_4, %c0_5] : memref<128x128xf32, #tpu.memory_space<vmem>>, vector<128x128xf32>
    %cst = arith.constant dense<0.000000e+00> : vector<128x128xf32>
    %7 = tpu.matmul %5, %4, %cst {dimension_numbers = #tpu.dot_dimension_numbers<[1], [0], [0], [1], [0, 0, 1, 1], [], []>} : vector<128x128xf32>, vector<128x128xf32>, vector<128x128xf32> -> vector<128x128xf32>
    %8 = arith.addf %6, %7 : vector<128x128xf32>
    %c0_6 = arith.constant 0 : index
    %c0_7 = arith.constant 0 : index
    %9 = vector.load %arg7[%c0_6, %c0_7] : memref<128x128xf32, #tpu.memory_space<vmem>>, vector<128x128xf32>
    tpu.vector_store %arg7[%c0_6, %c0_7], %8 {strides = array<i32>} : memref<128x128xf32, #tpu.memory_space<vmem>>, vector<128x128xf32>,
    %c0_i32_8 = arith.constant 0 : i32
    %10 = arith.cmpi eq, %arg2, %c0_i32_8 : i32
    %11 = arith.extui %10 : i1 to i32
    %c0_i32_9 = arith.constant 0 : i32
    %12 = arith.cmpi ne, %11, %c0_i32_9 : i32
    scf.if %12 {
      %c0_10 = arith.constant 0 : index
      %c0_11 = arith.constant 0 : index
      %13 = vector.load %arg7[%c0_10, %c0_11] : memref<128x128xf32, #tpu.memory_space<vmem>>, vector<128x128xf32>
      %c0_12 = arith.constant 0 : index
      %c0_13 = arith.constant 0 : index
      %14 = vector.load %arg5[%c0_12, %c0_13] : memref<1x128xf32, #tpu.memory_space<vmem>>, vector<1x128xf32>
      %15 = vector.broadcast %14 : vector<1x128xf32> to vector<128x128xf32>
      %16 = arith.addf %13, %15 : vector<128x128xf32>
      %c0_14 = arith.constant 0 : index
      %c0_15 = arith.constant 0 : index
      %17 = vector.load %arg6[%c0_14, %c0_15] : memref<128x128xf32, #tpu.memory_space<vmem>>, vector<128x128xf32>
      tpu.vector_store %arg6[%c0_14, %c0_15], %16 {strides = array<i32>} : memref<128x128xf32, #tpu.memory_space<vmem>>, vector<128x128xf32>,
    } else {
    }
    return
  }
  func.func @transform_0(%arg0: i32, %arg1: i32, %arg2: i32) -> (i32, i32) {
    %c0_i32 = arith.constant 0 : i32
    return %arg0, %arg2 : i32, i32
  }
  func.func @transform_1(%arg0: i32, %arg1: i32, %arg2: i32) -> (i32, i32) {
    %c0_i32 = arith.constant 0 : i32
    return %arg2, %arg1 : i32, i32
  }
  func.func @transform_2(%arg0: i32, %arg1: i32, %arg2: i32) -> (i32, i32) {
    %c0_i32 = arith.constant 0 : i32
    %c0_i32_0 = arith.constant 0 : i32
    return %c0_i32, %arg1 : i32, i32
  }
  func.func @transform_3(%arg0: i32, %arg1: i32, %arg2: i32) -> (i32, i32) {
    %c0_i32 = arith.constant 0 : i32
    return %arg0, %arg1 : i32, i32
  }
}

</mosaic_0001>

<bundles_post_ra>
// kernel: tpu_custom_call.1
= control target key start
LH: loop header
LB: loop body
LE: loop exit
PB: predicated region body
PF: predicated region fallthrough
CT: control target
= control target key end

     0   :  { %8 = vsyncpa [#allocation4], 0  ;;  %s707_s0 = inlined_call_operand.hbm [shape: bf16[128,128], index: 0, kind: input, shape index: {}]   ;;  %s708_s1 = inlined_call_operand.hbm [shape: f32[128,128], index: 1, kind: input, shape index: {}]   ;;  %s709_s2 = inlined_call_operand.vmem [shape: f32[1,128], index: 2, kind: input, shape index: {}]   ;;  %s710_s3 = inlined_call_operand.hbm [shape: f32[128,128], index: 3, kind: output, shape index: {}]  }
   0x1   :  { %9 = vsyncpa [#allocation7], 0 }
   0x2   :  { %10 = vsyncpa [#allocation5], 0  ;;  %s635_s12 = smov [#allocation3]   ;;  %s563_s16 = scalar_lea.hbm %s707_s0, 1024 }
   0x3   :  { %s16_s13 = sshll.u32 %s635_s12, 4  ;;  %p564_p0 = scmp.ne.s32.totalorder %s707_s0, %s563_s16  ;;  %s17_s13 = int_to_ptr.vmem [resolvable:$true] %s16_s13 }
   0x4   :  { %p567_p1 = scmp.lt.u32.totalorder %s563_s16, %s707_s0 }
   0x6   :  { %p569_p2 = pnand %p567_p1, %p564_p0 }
   0x8   :  { %572 = shalt.err (!%p569_p2)
}
   0x9   :  { %s573_s21 = scalar_lea.vmem %s17_s13, 1024  ;;  %p578_p4 = scmp.lt.s32.totalorder %s17_s13, %s17_s13 }
   0xa   :  { %p574_p3 = scmp.ne.s32.totalorder %s17_s13, %s573_s21  ;;  %p579_p5 = scmp.lt.s32.totalorder %s573_s21, %s573_s21 }
   0xc   :  { %p580_p6 = por %p579_p5, %p578_p4 }
   0xe   :  { %p581_p7 = pnand %p580_p6, %p574_p3 }
  0x10   :  { %584 = shalt.err (!%p581_p7)
}
  0x11   :  { %s636_s22 = smov 64   ;;  %s637_s23 = smov 4  }
  0x12   :  { %22 = dma.hbm_to_vmem [thread:$0]  %s707_s0, 1024, %s17_s13, [#allocation4], %s636_s22, %s636_s22, %s637_s23  }
  0x13   :  { %s638_s26 = smov [#allocation6]   ;;  %s585_s30 = scalar_lea.hbm %s708_s1, 2048 }
  0x14   :  { %s28_s27 = sshll.u32 %s638_s26, 4  ;;  %p586_p8 = scmp.ne.s32.totalorder %s708_s1, %s585_s30  ;;  %s29_s27 = int_to_ptr.vmem [resolvable:$true] %s28_s27 }
  0x15   :  { %p589_p9 = scmp.lt.u32.totalorder %s585_s30, %s708_s1 }
  0x17   :  { %p591_p10 = pnand %p589_p9, %p586_p8 }
  0x19   :  { %594 = shalt.err (!%p591_p10)
}
  0x1a   :  { %s595_s8 = scalar_lea.vmem %s29_s27, 2048  ;;  %p600_p12 = scmp.lt.s32.totalorder %s29_s27, %s29_s27 }
  0x1b   :  { %p596_p11 = scmp.ne.s32.totalorder %s29_s27, %s595_s8  ;;  %p601_p13 = scmp.lt.s32.totalorder %s595_s8, %s595_s8 }
  0x1d   :  { %p602_p0 = por %p601_p13, %p600_p12 }
  0x1f   :  { %p603_p1 = pnand %p602_p0, %p596_p11 }
  0x21   :  { %606 = shalt.err (!%p603_p1)
}
  0x22   :  { %s639_s0 = smov 128   ;;  %s640_s9 = smov 8  }
  0x23   :  { %34 = dma.hbm_to_vmem [thread:$0]  %s708_s1, 2048, %s29_s27, [#allocation7], %s639_s0, %s639_s0, %s640_s9  }
  0x24   :  { %629 = dma.done.wait [#allocation4], 1024  }
  0x25   :  { %630 = vsyncadd [#allocation4], 4294966272 }
  0x26   :  { %631 = dma.done.wait [#allocation7], 2048  }
  0x27   :  { %632 = vsyncadd [#allocation7], 4294965248  ;;  %v79_v0 = vld [vmem:[#allocation6] sm:$0xff]  ;;  %v80_v1 = vld [vmem:[#allocation6 + $0x8] sm:$0xff] }
  0x28   :  { %v81_v2 = vld [vmem:[#allocation6 + $0x10] sm:$0xff]  ;;  %v508_v3 = vpack.c.bf16 %v80_v1, %v79_v0  ;;  %v82_v4 = vld [vmem:[#allocation6 + $0x18] sm:$0xff]  ;;  %v83_v6 = vld [vmem:[#allocation6 + $0x20] sm:$0xff] }
  0x29   :  { %v512_v5 = vpack.c.bf16 %v82_v4, %v81_v2  ;;  %v84_v7 = vld [vmem:[#allocation6 + $0x28] sm:$0xff]  ;;  %v382_v9 = vld [vmem:[#allocation3] sm:$0xff]   ;;  %v85_v11 = vld [vmem:[#allocation6 + $0x30] sm:$0xff] }
  0x2a   :  { %509 = vmatprep.subr.bf16.mxu0 %v508_v3  ;;  %540 = vmatprep.subr.bf16.mxu1 %v508_v3  ;;  %v516_v8 = vpack.c.bf16 %v84_v7, %v83_v6  ;;  %v416_v10 = vld [vmem:[#allocation3 + $0x20] sm:$0xff]   ;;  %v86_v12 = vld [vmem:[#allocation6 + $0x38] sm:$0xff]  ;;  %v383_v13 = vunpack.c.l.bf16 %v382_v9  ;;  %v88_v17 = vld [vmem:[#allocation6 + $0x48] sm:$0xff]  ;;  %v384_v30 = vunpack.c.h.bf16 %v382_v9 }
  0x2b   :  { %511 = vmatpush3.bf16.msra.mxu0 %v508_v3  ;;  %548 = vmatpush3.bf16.msra.mxu1 %v508_v3  ;;  %v399_v14 = vunpack.c.l.bf16 %v416_v10  ;;  %v520_v15 = vpack.c.bf16 %v86_v12, %v85_v11  ;;  %v87_v16 = vld [vmem:[#allocation6 + $0x40] sm:$0xff]  ;;  %v89_v19 = vld [vmem:[#allocation6 + $0x50] sm:$0xff]  ;;  %v90_v20 = vld [vmem:[#allocation6 + $0x58] sm:$0xff]  ;;  %v400_v31 = vunpack.c.h.bf16 %v416_v10 }
  0x2c   :  { %513 = vmatprep.subr.bf16.mxu0 %v512_v5  ;;  %541 = vmatprep.subr.bf16.mxu1 %v512_v5  ;;  %v524_v18 = vpack.c.bf16 %v88_v17, %v87_v16  ;;  %v528_v21 = vpack.c.bf16 %v90_v20, %v89_v19  ;;  %v91_v22 = vld [vmem:[#allocation6 + $0x60] sm:$0xff]  ;;  %v92_v23 = vld [vmem:[#allocation6 + $0x68] sm:$0xff]  ;;  %v93_v25 = vld [vmem:[#allocation6 + $0x70] sm:$0xff] }
  0x2d   :  { %484 = vmatprep.mubr.f32.mxu0 %v383_v13  ;;  %496 = vmatprep.mubr.f32.mxu1 %v399_v14  ;;  %v532_v24 = vpack.c.bf16 %v92_v23, %v91_v22  ;;  %v94_v26 = vld [vmem:[#allocation6 + $0x78] sm:$0xff]  ;;  %v413_v28 = vld [vmem:[#allocation3 + $0x8] sm:$0xff]   ;;  %v414_v34 = vld [vmem:[#allocation3 + $0x10] sm:$0xff]  }
  0x2e   :  { %v536_v27 = vpack.c.bf16 %v94_v26, %v93_v25  ;;  %v417_v29 = vld [vmem:[#allocation3 + $0x28] sm:$0xff]   ;;  %v387_v32 = vunpack.c.l.bf16 %v413_v28  ;;  %v418_v35 = vld [vmem:[#allocation3 + $0x30] sm:$0xff]   ;;  %v388_v36 = vunpack.c.h.bf16 %v413_v28  ;;  %v391_v38 = vunpack.c.l.bf16 %v414_v34  ;;  %v415_v40 = vld [vmem:[#allocation3 + $0x18] sm:$0xff]  }
  0x2f   :  { %515 = vmatpush3.bf16.msra.mxu0 %v512_v5  ;;  %549 = vmatpush3.bf16.msra.mxu1 %v512_v5  ;;  %v403_v33 = vunpack.c.l.bf16 %v417_v29  ;;  %v404_v37 = vunpack.c.h.bf16 %v417_v29  ;;  %v407_v39 = vunpack.c.l.bf16 %v418_v35  ;;  %v419_v41 = vld [vmem:[#allocation3 + $0x38] sm:$0xff]   ;;  %v392_v42 = vunpack.c.h.bf16 %v414_v34  ;;  %v380_v48 = vld [vmem:[%s709_s2] ss:$0 sm:$0xff]  ;;  %s641_s2 = smov [#allocation8]  }
  0x30   :  { %517 = vmatprep.subr.bf16.mxu0 %v516_v8  ;;  %542 = vmatprep.subr.bf16.mxu1 %v516_v8  ;;  %v408_v43 = vunpack.c.h.bf16 %v418_v35  ;;  %v395_v44 = vunpack.c.l.bf16 %v415_v40  ;;  %v411_v45 = vunpack.c.l.bf16 %v419_v41  ;;  %v396_v46 = vunpack.c.h.bf16 %v415_v40  ;;  %s367_s13 = sshll.u32 %s641_s2, 4  ;;  %s368_s13 = int_to_ptr.vmem [resolvable:$true] %s367_s13 }
  0x31   :  { %v412_v47 = vunpack.c.h.bf16 %v419_v41  ;;  %s607_s14 = scalar_lea.vmem %s368_s13, 2048  ;;  %p612_p3 = scmp.lt.s32.totalorder %s368_s13, %s368_s13 }
  0x32   :  { %p608_p2 = scmp.ne.s32.totalorder %s368_s13, %s607_s14  ;;  %p613_p4 = scmp.lt.s32.totalorder %s607_s14, %s607_s14 }
  0x33   :  { %519 = vmatpush3.bf16.msra.mxu0 %v516_v8  ;;  %550 = vmatpush3.bf16.msra.mxu1 %v516_v8 }
  0x34   :  { %521 = vmatprep.subr.bf16.mxu0 %v520_v15  ;;  %543 = vmatprep.subr.bf16.mxu1 %v520_v15  ;;  %p614_p5 = por %p613_p4, %p612_p3 }
  0x36   :  { %p615_p6 = pnand %p614_p5, %p608_p2 }
  0x37   :  { %523 = vmatpush3.bf16.msra.mxu0 %v520_v15  ;;  %551 = vmatpush3.bf16.msra.mxu1 %v520_v15 }
  0x38   :  { %525 = vmatprep.subr.bf16.mxu0 %v524_v18  ;;  %544 = vmatprep.subr.bf16.mxu1 %v524_v18 }
  0x3b   :  { %527 = vmatpush3.bf16.msra.mxu0 %v524_v18  ;;  %552 = vmatpush3.bf16.msra.mxu1 %v524_v18 }
  0x3c   :  { %529 = vmatprep.subr.bf16.mxu0 %v528_v21  ;;  %545 = vmatprep.subr.bf16.mxu1 %v528_v21 }
  0x3f   :  { %531 = vmatpush3.bf16.msra.mxu0 %v528_v21  ;;  %553 = vmatpush3.bf16.msra.mxu1 %v528_v21 }
  0x40   :  { %533 = vmatprep.subr.bf16.mxu0 %v532_v24  ;;  %546 = vmatprep.subr.bf16.mxu1 %v532_v24 }
  0x43   :  { %535 = vmatpush3.bf16.msra.mxu0 %v532_v24  ;;  %554 = vmatpush3.bf16.msra.mxu1 %v532_v24 }
  0x44   :  { %537 = vmatprep.subr.bf16.mxu0 %v536_v27  ;;  %547 = vmatprep.subr.bf16.mxu1 %v536_v27 }
  0x47   :  { %539 = vmatpush3.bf16.msra.mxu0 %v536_v27  ;;  %555 = vmatpush3.bf16.msra.mxu1 %v536_v27 }
  0x4a   :  { %485 = vmatmul.mubr.f32.vlgmr.msra.gmra.mrb[0].mxu0 %v384_v30  ;;  %497 = vmatmul.mubr.f32.vlgmr.msra.gmra.mrb[0].mxu1 %v400_v31 }
  0x4b   :  { %487 = vmatprep.mubr.f32.mxu0 %v387_v32  ;;  %499 = vmatprep.mubr.f32.mxu1 %v403_v33 }
  0x4e   :  { %488 = vmatmul.mubr.f32.gmra.mrb[2].mxu0 %v388_v36  ;;  %500 = vmatmul.mubr.f32.gmra.mrb[2].mxu1 %v404_v37 }
  0x4f   :  { %490 = vmatprep.mubr.f32.mxu0 %v391_v38  ;;  %502 = vmatprep.mubr.f32.mxu1 %v407_v39 }
  0x52   :  { %491 = vmatmul.mubr.f32.gmra.mrb[4].mxu0 %v392_v42  ;;  %503 = vmatmul.mubr.f32.gmra.mrb[4].mxu1 %v408_v43 }
  0x53   :  { %493 = vmatprep.mubr.f32.mxu0 %v395_v44  ;;  %505 = vmatprep.mubr.f32.mxu1 %v411_v45 }
  0x56   :  { %494 = vmatmul.mubr.f32.gmra.mrb[6].mxu0 %v396_v46  ;;  %506 = vmatmul.mubr.f32.gmra.mrb[6].mxu1 %v412_v47 }
 0x11d   :  { %v486_v49 = vpop.f32.mrb[0].mxu0  ;;  %v498_v50 = vpop.f32.mrb[0].mxu1 }
 0x11e   :  { %v331_v51 = vadd.f32 %v486_v49, %v380_v48  ;;  %v339_v52 = vadd.f32 %v498_v50, %v380_v48  ;;  %v193_v53 = vpop.f32.mrb[1].mxu0  ;;  %v233_v54 = vpop.f32.mrb[1].mxu1 }
 0x11f   :  { %v330_v55 = vadd.f32 %v380_v48, %v193_v53  ;;  %v338_v56 = vadd.f32 %v380_v48, %v233_v54 }
 0x120   :  { %347 = vst [vmem:[#allocation8 + $0x8] sm:$0xff] %v331_v51  ;;  %355 = vst [vmem:[#allocation8 + $0x48] sm:$0xff] %v339_v52 }
 0x121   :  { %346 = vst [vmem:[#allocation8] sm:$0xff] %v330_v55  ;;  %354 = vst [vmem:[#allocation8 + $0x40] sm:$0xff] %v338_v56  ;;  %v489_v57 = vpop.f32.mrb[2].mxu0  ;;  %v501_v58 = vpop.f32.mrb[2].mxu1 }
 0x122   :  { %v333_v59 = vadd.f32 %v489_v57, %v380_v48  ;;  %v341_v60 = vadd.f32 %v501_v58, %v380_v48  ;;  %v203_v61 = vpop.f32.mrb[3].mxu0  ;;  %v243_v62 = vpop.f32.mrb[3].mxu1 }
 0x123   :  { %v332_v63 = vadd.f32 %v380_v48, %v203_v61  ;;  %v340_v0 = vadd.f32 %v380_v48, %v243_v62 }
 0x124   :  { %349 = vst [vmem:[#allocation8 + $0x18] sm:$0xff] %v333_v59  ;;  %357 = vst [vmem:[#allocation8 + $0x58] sm:$0xff] %v341_v60 }
 0x125   :  { %348 = vst [vmem:[#allocation8 + $0x10] sm:$0xff] %v332_v63  ;;  %356 = vst [vmem:[#allocation8 + $0x50] sm:$0xff] %v340_v0  ;;  %v492_v1 = vpop.f32.mrb[4].mxu0  ;;  %v504_v2 = vpop.f32.mrb[4].mxu1 }
 0x126   :  { %v335_v3 = vadd.f32 %v492_v1, %v380_v48  ;;  %v343_v4 = vadd.f32 %v504_v2, %v380_v48  ;;  %v213_v5 = vpop.f32.mrb[5].mxu0  ;;  %v253_v6 = vpop.f32.mrb[5].mxu1 }
 0x127   :  { %v334_v7 = vadd.f32 %v380_v48, %v213_v5  ;;  %v342_v8 = vadd.f32 %v380_v48, %v253_v6 }
 0x128   :  { %351 = vst [vmem:[#allocation8 + $0x28] sm:$0xff] %v335_v3  ;;  %359 = vst [vmem:[#allocation8 + $0x68] sm:$0xff] %v343_v4 }
 0x129   :  { %350 = vst [vmem:[#allocation8 + $0x20] sm:$0xff] %v334_v7  ;;  %358 = vst [vmem:[#allocation8 + $0x60] sm:$0xff] %v342_v8  ;;  %v495_v9 = vpop.f32.mrb[6].mxu0  ;;  %v507_v10 = vpop.f32.mrb[6].mxu1 }
 0x12a   :  { %v337_v11 = vadd.f32 %v495_v9, %v380_v48  ;;  %v345_v12 = vadd.f32 %v507_v10, %v380_v48  ;;  %v223_v13 = vpop.f32.mrb[7].mxu0  ;;  %v263_v14 = vpop.f32.mrb[7].mxu1 }
 0x12b   :  { %v336_v15 = vadd.f32 %v380_v48, %v223_v13  ;;  %v344_v16 = vadd.f32 %v380_v48, %v263_v14 }
 0x12c   :  { %353 = vst [vmem:[#allocation8 + $0x38] sm:$0xff] %v337_v11  ;;  %361 = vst [vmem:[#allocation8 + $0x78] sm:$0xff] %v345_v12 }
 0x12d   :  { %352 = vst [vmem:[#allocation8 + $0x30] sm:$0xff] %v336_v15  ;;  %360 = vst [vmem:[#allocation8 + $0x70] sm:$0xff] %v344_v16 }
 0x12e   :  { %618 = shalt.err (!%p615_p6)
}
 0x12f   :  { %s619_s17 = scalar_lea.hbm %s710_s3, 2048 }
 0x130   :  { %p620_p7 = scmp.ne.s32.totalorder %s710_s3, %s619_s17  ;;  %p623_p8 = scmp.lt.u32.totalorder %s619_s17, %s710_s3 }
 0x132   :  { %p625_p9 = pnand %p623_p8, %p620_p7 }
 0x134   :  { %628 = shalt.err (!%p625_p9)
}
 0x135   :  { %373 = dma.vmem_to_hbm [thread:$0]  %s368_s13, 2048, %s710_s3, [#allocation5], %s639_s0, %s639_s0, %s640_s9  }
 0x136   :  { %633 = dma.done.wait [#allocation5], 2048  }
 0x137   :  { %634 = vsyncadd [#allocation5], 4294965248 }
 0x138   :  { %377 = vsyncpa [#allocation4], 1 }
 0x139   :  { %378 = vsyncpa [#allocation7], 1 }
 0x13a   :  { %379 = vsyncpa [#allocation5], 1 }

</bundles_post_ra>
